<compile_context>
chip_gen: v7x
topology: tpu7x:2x2x1
jax: 0.10.0
libtpu: 0.0.40
codegen_flags: <defaults>
</compile_context>

<pallas_src>
import jax
import jax.numpy as jnp
from jax.experimental import pallas as pl
from jax.experimental.pallas import tpu as pltpu

LANE = 128
SUBLANE = 8


def _round_up(n, m):
    return ((n + m - 1) // m) * m


def speaker_classifier_kernel(x_ref, w1_ref, b1_ref, w2_ref, b2_ref, o_ref):
    """Fused fc1 -> ReLU -> fc2 on one batch tile.

    x_ref : (TB, Dpad)    f32   (contraction dim zero-padded to 128 lanes)
    w1_ref: (Dpad, H)     f32 / bf16
    b1_ref: (1, H)        f32
    w2_ref: (H, Cpad)     f32 / bf16 (class dim zero-padded to 128 lanes)
    b2_ref: (1, Cpad)     f32
    o_ref : (TB, Cpad)    f32
    """
    mxu_dtype = w1_ref.dtype
    # fc1 on the MXU with f32 accumulation.
    h = jnp.dot(x_ref[...].astype(mxu_dtype), w1_ref[...],
                preferred_element_type=jnp.float32)
    # Bias + ReLU stay f32 on the VPU (epilogue while the MXU result drains).
    h = jnp.maximum(h + b1_ref[...], 0.0)
    # fc2 on the MXU, lane-dense (padded) output columns.
    out = jnp.dot(h.astype(mxu_dtype), w2_ref[...],
                  preferred_element_type=jnp.float32)
    o_ref[...] = (out + b2_ref[...]).astype(o_ref.dtype)


def speaker_classifier(x, w1, b1, w2, b2, *, block_b=128,
                       param_dtype=jnp.float32):
    """x: (B, input_dim) f32. Weights stored transposed: w1 (D, 128), w2 (128, C).

    Returns logits (B, C) f32 — identical semantics to fc2(relu(fc1(x))).
    """
    B, D = x.shape
    D_w, H = w1.shape
    assert D == D_w, (D, D_w)
    C = w2.shape[1]

    C_pad = _round_up(max(C, LANE), LANE)   # lane-dense output width
    D_pad = _round_up(max(D, LANE), LANE)   # lane-dense contraction width

    # Zero-pad params; padded rows/cols contribute exactly zero.
    w1p = jnp.zeros((D_pad, H), dtype=param_dtype).at[:D, :].set(
        w1.astype(param_dtype))
    w2p = jnp.zeros((H, C_pad), dtype=param_dtype).at[:, :C].set(
        w2.astype(param_dtype))
    b1r = b1.astype(jnp.float32).reshape(1, H)
    b2p = jnp.zeros((1, C_pad), dtype=jnp.float32).at[0, :C].set(
        b2.astype(jnp.float32))

    def _cost(rows):
        flops = 2 * rows * (D_pad * H + H * C_pad)
        bytes_accessed = (rows * D_pad * 4
                          + w1p.size * w1p.dtype.itemsize
                          + w2p.size * w2p.dtype.itemsize
                          + b1r.size * 4 + b2p.size * 4
                          + rows * C_pad * 4)
        return pl.CostEstimate(flops=int(flops), transcendentals=0,
                               bytes_accessed=int(bytes_accessed))

    B_sub = _round_up(B, SUBLANE)

    if B_sub <= block_b:
        # ---- Path A: small batch — gridless, everything resident in VMEM ----
        B_pad = B_sub
        xp = jnp.pad(x.astype(jnp.float32), ((0, B_pad - B), (0, D_pad - D)))
        out = pl.pallas_call(
            speaker_classifier_kernel,
            out_shape=jax.ShapeDtypeStruct((B_pad, C_pad), jnp.float32),
            in_specs=[pl.BlockSpec(memory_space=pltpu.MemorySpace.VMEM)] * 5,
            out_specs=pl.BlockSpec(memory_space=pltpu.MemorySpace.VMEM),
            cost_estimate=_cost(B_pad),
        )(xp, w1p, b1r, w2p, b2p)
        return out[:B, :C]

    # ---- Path B: batched — tile the batch axis, params resident across grid ----
    TB = block_b
    B_pad = _round_up(B, TB)
    xp = jnp.pad(x.astype(jnp.float32), ((0, B_pad - B), (0, D_pad - D)))
    out = pl.pallas_call(
        speaker_classifier_kernel,
        out_shape=jax.ShapeDtypeStruct((B_pad, C_pad), jnp.float32),
        grid=(B_pad // TB,),
        in_specs=[
            pl.BlockSpec((TB, D_pad), lambda i: (i, 0)),     # x tile walks batch
            pl.BlockSpec((D_pad, H), lambda i: (0, 0)),      # w1 resident
            pl.BlockSpec((1, H), lambda i: (0, 0)),          # b1 resident
            pl.BlockSpec((H, C_pad), lambda i: (0, 0)),      # w2 resident
            pl.BlockSpec((1, C_pad), lambda i: (0, 0)),      # b2 resident
        ],
        out_specs=pl.BlockSpec((TB, C_pad), lambda i: (i, 0)),
        compiler_params=pltpu.CompilerParams(
            dimension_semantics=("parallel",),   # megacore sharding on v7x
        ),
        cost_estimate=_cost(B_pad),
    )(xp, w1p, b1r, w2p, b2p)
    return out[:B, :C]


def _reference_forward(x, w1, b1, w2, b2, mxu_dtype=jnp.float32):
    """Pure-JAX reference with matching operand dtype + f32 accumulation."""
    h = jnp.dot(x.astype(mxu_dtype), w1.astype(mxu_dtype),
                preferred_element_type=jnp.float32)
    h = jnp.maximum(h + b1.astype(jnp.float32), 0.0)
    o = jnp.dot(h.astype(mxu_dtype), w2.astype(mxu_dtype),
                preferred_element_type=jnp.float32)
    return o + b2.astype(jnp.float32)


if __name__ == "__main__":
    # Shapes consistent with the module: MFCC-ish input_dim=40, 5 speakers.
    B = 8            # small batch (gridless path)
    INPUT_DIM = 40   # input_dim
    HIDDEN = 128     # fc1 out_features (fixed by the module)
    NUM_CLASSES = 5  # num_classes

    key = jax.random.PRNGKey(0)
    kx, kw1, kb1, kw2, kb2 = jax.random.split(key, 5)

    x = jax.random.normal(kx, (B, INPUT_DIM), dtype=jnp.float32)
    # Deterministic synthetic params (stored (in, out), i.e. transposed vs PyTorch).
    w1 = jax.random.normal(kw1, (INPUT_DIM, HIDDEN), dtype=jnp.float32) * 0.05
    b1 = jax.random.normal(kb1, (HIDDEN,), dtype=jnp.float32) * 0.05
    w2 = jax.random.normal(kw2, (HIDDEN, NUM_CLASSES), dtype=jnp.float32) * 0.05
    b2 = jax.random.normal(kb2, (NUM_CLASSES,), dtype=jnp.float32) * 0.05

    # ---- Path A: small batch, gridless, f32 params (exact PyTorch semantics) ----
    logits = speaker_classifier(x, w1, b1, w2, b2,
                                block_b=128, param_dtype=jnp.float32)
    logits = jax.block_until_ready(logits)
    ref = _reference_forward(x, w1, b1, w2, b2, jnp.float32)
    assert logits.shape == (B, NUM_CLASSES)
    assert jnp.allclose(logits, ref, atol=1e-4, rtol=1e-4), (
        float(jnp.max(jnp.abs(logits - ref))))

    # ---- Path B: batched grid with resident weights (+ bf16 MXU operands) ----
    B_BIG = 256
    xb = jax.random.normal(jax.random.PRNGKey(1), (B_BIG, INPUT_DIM),
                           dtype=jnp.float32)
    logits_b = speaker_classifier(xb, w1, b1, w2, b2,
                                  block_b=128, param_dtype=jnp.bfloat16)
    logits_b = jax.block_until_ready(logits_b)
    ref_b = _reference_forward(xb, w1, b1, w2, b2, jnp.bfloat16)
    assert logits_b.shape == (B_BIG, NUM_CLASSES)
    assert jnp.allclose(logits_b, ref_b, atol=1e-2, rtol=1e-2), (
        float(jnp.max(jnp.abs(logits_b - ref_b))))

    print("KERNEL_OK")
</pallas_src>

<mosaic_0001>
module attributes {stable_mosaic.version = 11 : i64} {
  func.func @speaker_classifier_kernel(%arg0: memref<8x128xf32, #tpu.memory_space<vmem>>, %arg1: memref<128x128xf32, #tpu.memory_space<vmem>>, %arg2: memref<1x128xf32, #tpu.memory_space<vmem>>, %arg3: memref<128x128xf32, #tpu.memory_space<vmem>>, %arg4: memref<1x128xf32, #tpu.memory_space<vmem>>, %arg5: memref<8x128xf32, #tpu.memory_space<vmem>>) attributes {dimension_semantics = [], scalar_prefetch = 0 : i64, scratch_operands = 0 : i64, tpu.core_type = #tpu.core_type<tc>} {
    %c0 = arith.constant 0 : index
    %c0_0 = arith.constant 0 : index
    %0 = vector.load %arg0[%c0, %c0_0] : memref<8x128xf32, #tpu.memory_space<vmem>>, vector<8x128xf32>
    %c0_1 = arith.constant 0 : index
    %c0_2 = arith.constant 0 : index
    %1 = vector.load %arg1[%c0_1, %c0_2] : memref<128x128xf32, #tpu.memory_space<vmem>>, vector<128x128xf32>
    %cst = arith.constant dense<0.000000e+00> : vector<8x128xf32>
    %2 = tpu.matmul %0, %1, %cst {dimension_numbers = #tpu.dot_dimension_numbers<[1], [0], [0], [1], [0, 0, 1, 1], [], []>} : vector<8x128xf32>, vector<128x128xf32>, vector<8x128xf32> -> vector<8x128xf32>
    %c0_3 = arith.constant 0 : index
    %c0_4 = arith.constant 0 : index
    %3 = vector.load %arg2[%c0_3, %c0_4] : memref<1x128xf32, #tpu.memory_space<vmem>>, vector<1x128xf32>
    %4 = vector.broadcast %3 : vector<1x128xf32> to vector<8x128xf32>
    %5 = arith.addf %2, %4 : vector<8x128xf32>
    %cst_5 = arith.constant 0.000000e+00 : f32
    %6 = vector.broadcast %cst_5 : f32 to vector<8x128xf32>
    %7 = arith.maximumf %5, %6 : vector<8x128xf32>
    %c0_6 = arith.constant 0 : index
    %c0_7 = arith.constant 0 : index
    %8 = vector.load %arg3[%c0_6, %c0_7] : memref<128x128xf32, #tpu.memory_space<vmem>>, vector<128x128xf32>
    %cst_8 = arith.constant dense<0.000000e+00> : vector<8x128xf32>
    %9 = tpu.matmul %7, %8, %cst_8 {dimension_numbers = #tpu.dot_dimension_numbers<[1], [0], [0], [1], [0, 0, 1, 1], [], []>} : vector<8x128xf32>, vector<128x128xf32>, vector<8x128xf32> -> vector<8x128xf32>
    %c0_9 = arith.constant 0 : index
    %c0_10 = arith.constant 0 : index
    %10 = vector.load %arg4[%c0_9, %c0_10] : memref<1x128xf32, #tpu.memory_space<vmem>>, vector<1x128xf32>
    %11 = vector.broadcast %10 : vector<1x128xf32> to vector<8x128xf32>
    %12 = arith.addf %9, %11 : vector<8x128xf32>
    %c0_11 = arith.constant 0 : index
    %c0_12 = arith.constant 0 : index
    %13 = vector.load %arg5[%c0_11, %c0_12] : memref<8x128xf32, #tpu.memory_space<vmem>>, vector<8x128xf32>
    tpu.vector_store %arg5[%c0_11, %c0_12], %12 {strides = array<i32>} : memref<8x128xf32, #tpu.memory_space<vmem>>, vector<8x128xf32>,
    return
  }
}

</mosaic_0001>

<bundles_post_ra>
// kernel: tpu_custom_call.1
= control target key start
LH: loop header
LB: loop body
LE: loop exit
PB: predicated region body
PF: predicated region fallthrough
CT: control target
= control target key end

     0   :  { %10 = vsyncpa [#allocation3], 0  ;;  %s637_s0 = inlined_call_operand.hbm [shape: f32[8,128], index: 0, kind: input, shape index: {}]   ;;  %s638_s1 = inlined_call_operand.hbm [shape: f32[128,128], index: 1, kind: input, shape index: {}]   ;;  %s639_s2 = inlined_call_operand.vmem [shape: f32[1,128], index: 2, kind: input, shape index: {}]   ;;  %s640_s3 = inlined_call_operand.hbm [shape: f32[128,128], index: 3, kind: input, shape index: {}]   ;;  %s641_s4 = inlined_call_operand.vmem [shape: f32[1,128], index: 4, kind: input, shape index: {}]   ;;  %s642_s5 = inlined_call_operand.hbm [shape: f32[8,128], index: 5, kind: output, shape index: {}]  }
   0x1   :  { %11 = vsyncpa [#allocation6], 0 }
   0x2   :  { %12 = vsyncpa [#allocation4], 0  ;;  %s522_s18 = smov [#allocation5]   ;;  %s428_s22 = scalar_lea.hbm %s638_s1, 2048 }
   0x3   :  { %s28_s19 = sshll.u32 %s522_s18, 4  ;;  %p429_p0 = scmp.ne.s32.totalorder %s638_s1, %s428_s22  ;;  %s29_s19 = int_to_ptr.vmem [resolvable:$true] %s28_s19 }
   0x4   :  { %p432_p1 = scmp.lt.u32.totalorder %s428_s22, %s638_s1 }
   0x6   :  { %p434_p2 = pnand %p432_p1, %p429_p0 }
   0x8   :  { %437 = shalt.err (!%p434_p2)
}
   0x9   :  { %s438_s27 = scalar_lea.vmem %s29_s19, 2048  ;;  %p443_p4 = scmp.lt.s32.totalorder %s29_s19, %s29_s19 }
   0xa   :  { %p439_p3 = scmp.ne.s32.totalorder %s29_s19, %s438_s27  ;;  %p444_p5 = scmp.lt.s32.totalorder %s438_s27, %s438_s27 }
   0xc   :  { %p445_p6 = por %p444_p5, %p443_p4 }
   0xe   :  { %p446_p7 = pnand %p445_p6, %p439_p3 }
  0x10   :  { %449 = shalt.err (!%p446_p7)
}
  0x11   :  { %s523_s28 = smov 128   ;;  %s524_s29 = smov 8  }
  0x12   :  { %34 = dma.hbm_to_vmem [thread:$0]  %s638_s1, 2048, %s29_s19, [#allocation6], %s523_s28, %s523_s28, %s524_s29  }
  0x13   :  { %s525_s7 = smov [#allocation2]   ;;  %s526_s9 = smov [#allocation7]  }
  0x14   :  { %s19_s8 = sshll.u32 %s525_s7, 4  ;;  %s42_s10 = sshll.u32 %s526_s9, 4  ;;  %s20_s8 = int_to_ptr.vmem [resolvable:$true] %s19_s8  ;;  %s43_s10 = int_to_ptr.vmem [resolvable:$true] %s42_s10 }
  0x15   :  { %s450_s13 = scalar_lea.hbm %s637_s0, 128 }
  0x16   :  { %p451_p8 = scmp.ne.s32.totalorder %s637_s0, %s450_s13  ;;  %p454_p9 = scmp.lt.u32.totalorder %s450_s13, %s637_s0 }
  0x18   :  { %p456_p10 = pnand %p454_p9, %p451_p8 }
  0x1a   :  { %459 = shalt.err (!%p456_p10)
}
  0x1b   :  { %s460_s1 = scalar_lea.vmem %s20_s8, 128  ;;  %p465_p12 = scmp.lt.s32.totalorder %s20_s8, %s20_s8 }
  0x1c   :  { %p461_p11 = scmp.ne.s32.totalorder %s20_s8, %s460_s1  ;;  %p466_p13 = scmp.lt.s32.totalorder %s460_s1, %s460_s1 }
  0x1e   :  { %p467_p0 = por %p466_p13, %p465_p12 }
  0x20   :  { %p468_p1 = pnand %p467_p0, %p461_p11 }
  0x22   :  { %471 = shalt.err (!%p468_p1)
}
  0x23   :  { %22 = dma.hbm_to_vmem [thread:$0]  %s637_s0, 128, %s20_s8, [#allocation3]  }
  0x24   :  { %s472_s22 = scalar_lea.hbm %s640_s3, 2048 }
  0x25   :  { %p473_p2 = scmp.ne.s32.totalorder %s640_s3, %s472_s22  ;;  %p476_p3 = scmp.lt.u32.totalorder %s472_s22, %s640_s3 }
  0x27   :  { %p478_p4 = pnand %p476_p3, %p473_p2 }
  0x29   :  { %481 = shalt.err (!%p478_p4)
}
  0x2a   :  { %s482_s27 = scalar_lea.vmem %s43_s10, 2048  ;;  %p487_p6 = scmp.lt.s32.totalorder %s43_s10, %s43_s10 }
  0x2b   :  { %p483_p5 = scmp.ne.s32.totalorder %s43_s10, %s482_s27  ;;  %p488_p7 = scmp.lt.s32.totalorder %s482_s27, %s482_s27 }
  0x2d   :  { %p489_p8 = por %p488_p7, %p487_p6 }
  0x2f   :  { %p490_p9 = pnand %p489_p8, %p483_p5 }
  0x31   :  { %493 = shalt.err (!%p490_p9)
}
  0x32   :  { %48 = dma.hbm_to_vmem [thread:$0]  %s640_s3, 2048, %s43_s10, [#allocation6], %s523_s28, %s523_s28, %s524_s29  }
  0x33   :  { %516 = dma.done.wait [#allocation3], 128  }
  0x34   :  { %517 = vsyncadd [#allocation3], 4294967168 }
  0x35   :  { %518 = dma.done.wait [#allocation6], 4096  }
  0x36   :  { %519 = vsyncadd [#allocation6], 4294963200  ;;  %v527_v0 = vmov 0.0|0.0   ;;  %vm528_vm0 = vmmov 0   ;;  %v529_v1 = vmov 0.0   ;;  %v61_v2 = vld [vmem:[#allocation5] sm:$0xff] }
  0x37   :  { %371 = vmatprep.subr.bf16.mxu0 %v527_v0  ;;  %333 = vmatprep.mubr.msk.f32.mxu0 %vm528_vm0, %v529_v1  ;;  %v62_v3 = vld [vmem:[#allocation5 + $0x8] sm:$0xff]  ;;  %v63_v4 = vld [vmem:[#allocation5 + $0x10] sm:$0xff]  ;;  %v64_v6 = vld [vmem:[#allocation5 + $0x18] sm:$0xff]  ;;  %s530_s7 = smov [#allocation8]  }
  0x38   :  { %395 = vmatprep.subr.bf16.mxu1 %v527_v0  ;;  %368 = vmatprep.mubr.msk.f32.mxu1 %vm528_vm0, %v529_v1  ;;  %v372_v5 = vpack.c.bf16 %v62_v3, %v61_v2  ;;  %v375_v7 = vpack.c.bf16 %v64_v6, %v63_v4  ;;  %v65_v8 = vld [vmem:[#allocation5 + $0x20] sm:$0xff]  ;;  %v66_v9 = vld [vmem:[#allocation5 + $0x28] sm:$0xff]  ;;  %v157_v12 = vld [vmem:[#allocation7 + $0x10] sm:$0xff]  ;;  %s255_s8 = sshll.u32 %s530_s7, 4  ;;  %s256_s8 = int_to_ptr.vmem [resolvable:$true] %s255_s8 }
  0x39   :  { %v155_v10 = vld [vmem:[#allocation7] sm:$0xff]  ;;  %v156_v11 = vld [vmem:[#allocation7 + $0x8] sm:$0xff]  ;;  %v158_v13 = vld [vmem:[#allocation7 + $0x18] sm:$0xff]  ;;  %v378_v14 = vpack.c.bf16 %v66_v9, %v65_v8  ;;  %s494_s9 = scalar_lea.vmem %s256_s8, 128  ;;  %p499_p11 = scmp.lt.s32.totalorder %s256_s8, %s256_s8 }
  0x3a   :  { %373 = vmatpush3.bf16.msra.mxu0 %v372_v5  ;;  %v396_v15 = vpack.c.bf16 %v156_v11, %v155_v10  ;;  %v67_v16 = vld [vmem:[#allocation5 + $0x30] sm:$0xff]  ;;  %v68_v17 = vld [vmem:[#allocation5 + $0x38] sm:$0xff]  ;;  %v399_v18 = vpack.c.bf16 %v158_v13, %v157_v12  ;;  %v159_v19 = vld [vmem:[#allocation7 + $0x20] sm:$0xff]  ;;  %p495_p10 = scmp.ne.s32.totalorder %s256_s8, %s494_s9  ;;  %p500_p12 = scmp.lt.s32.totalorder %s494_s9, %s494_s9 }
  0x3b   :  { %374 = vmatprep.subr.bf16.mxu0 %v527_v0  ;;  %v160_v20 = vld [vmem:[#allocation7 + $0x28] sm:$0xff]  ;;  %v381_v21 = vpack.c.bf16 %v68_v17, %v67_v16  ;;  %v69_v22 = vld [vmem:[#allocation5 + $0x40] sm:$0xff]  ;;  %v161_v25 = vld [vmem:[#allocation7 + $0x30] sm:$0xff] }
  0x3c   :  { %397 = vmatpush3.bf16.msra.mxu1 %v396_v15  ;;  %v70_v23 = vld [vmem:[#allocation5 + $0x48] sm:$0xff]  ;;  %v402_v24 = vpack.c.bf16 %v160_v20, %v159_v19  ;;  %v162_v26 = vld [vmem:[#allocation7 + $0x38] sm:$0xff]  ;;  %v71_v28 = vld [vmem:[#allocation5 + $0x50] sm:$0xff]  ;;  %p501_p13 = por %p500_p12, %p499_p11 }
  0x3d   :  { %398 = vmatprep.subr.bf16.mxu1 %v527_v0  ;;  %v384_v27 = vpack.c.bf16 %v70_v23, %v69_v22  ;;  %v72_v29 = vld [vmem:[#allocation5 + $0x58] sm:$0xff]  ;;  %v405_v30 = vpack.c.bf16 %v162_v26, %v161_v25  ;;  %v163_v31 = vld [vmem:[#allocation7 + $0x40] sm:$0xff]  ;;  %v164_v32 = vld [vmem:[#allocation7 + $0x48] sm:$0xff] }
  0x3e   :  { %376 = vmatpush3.bf16.msra.mxu0 %v375_v7  ;;  %v387_v33 = vpack.c.bf16 %v72_v29, %v71_v28  ;;  %v73_v34 = vld [vmem:[#allocation5 + $0x60] sm:$0xff]  ;;  %v74_v35 = vld [vmem:[#allocation5 + $0x68] sm:$0xff]  ;;  %v408_v36 = vpack.c.bf16 %v164_v32, %v163_v31  ;;  %v165_v37 = vld [vmem:[#allocation7 + $0x50] sm:$0xff]  ;;  %p502_p0 = pnand %p501_p13, %p495_p10 }
  0x3f   :  { %377 = vmatprep.subr.bf16.mxu0 %v527_v0  ;;  %v166_v38 = vld [vmem:[#allocation7 + $0x58] sm:$0xff]  ;;  %v390_v39 = vpack.c.bf16 %v74_v35, %v73_v34  ;;  %v75_v40 = vld [vmem:[#allocation5 + $0x70] sm:$0xff]  ;;  %v167_v43 = vld [vmem:[#allocation7 + $0x60] sm:$0xff] }
  0x40   :  { %400 = vmatpush3.bf16.msra.mxu1 %v399_v18  ;;  %v76_v41 = vld [vmem:[#allocation5 + $0x78] sm:$0xff]  ;;  %v411_v42 = vpack.c.bf16 %v166_v38, %v165_v37  ;;  %v168_v44 = vld [vmem:[#allocation7 + $0x68] sm:$0xff]  ;;  %v169_v48 = vld [vmem:[#allocation7 + $0x70] sm:$0xff] }
  0x41   :  { %401 = vmatprep.subr.bf16.mxu1 %v527_v0  ;;  %v393_v45 = vpack.c.bf16 %v76_v41, %v75_v40  ;;  %v414_v46 = vpack.c.bf16 %v168_v44, %v167_v43  ;;  %v60_v47 = vld [vmem:[#allocation2] sm:$0xff] }
  0x42   :  { %379 = vmatpush3.bf16.msra.mxu0 %v378_v14  ;;  %v170_v49 = vld [vmem:[#allocation7 + $0x78] sm:$0xff] }
  0x43   :  { %380 = vmatprep.subr.bf16.mxu0 %v527_v0  ;;  %v417_v50 = vpack.c.bf16 %v170_v49, %v169_v48  ;;  %v265_v51 = vld [vmem:[%s639_s2] ss:$0 sm:$0xff] }
  0x44   :  { %403 = vmatpush3.bf16.msra.mxu1 %v402_v24  ;;  %v266_v56 = vld [vmem:[%s641_s4] ss:$0 sm:$0xff] }
  0x45   :  { %404 = vmatprep.subr.bf16.mxu1 %v527_v0 }
  0x46   :  { %382 = vmatpush3.bf16.msra.mxu0 %v381_v21 }
  0x47   :  { %383 = vmatprep.subr.bf16.mxu0 %v527_v0 }
  0x48   :  { %406 = vmatpush3.bf16.msra.mxu1 %v405_v30 }
  0x49   :  { %407 = vmatprep.subr.bf16.mxu1 %v527_v0 }
  0x4a   :  { %385 = vmatpush3.bf16.msra.mxu0 %v384_v27 }
  0x4b   :  { %386 = vmatprep.subr.bf16.mxu0 %v527_v0 }
  0x4c   :  { %409 = vmatpush3.bf16.msra.mxu1 %v408_v36 }
  0x4d   :  { %410 = vmatprep.subr.bf16.mxu1 %v527_v0 }
  0x4e   :  { %388 = vmatpush3.bf16.msra.mxu0 %v387_v33 }
  0x4f   :  { %389 = vmatprep.subr.bf16.mxu0 %v527_v0 }
  0x50   :  { %412 = vmatpush3.bf16.msra.mxu1 %v411_v42 }
  0x51   :  { %413 = vmatprep.subr.bf16.mxu1 %v527_v0 }
  0x52   :  { %391 = vmatpush3.bf16.msra.mxu0 %v390_v39 }
  0x53   :  { %392 = vmatprep.subr.bf16.mxu0 %v527_v0 }
  0x54   :  { %415 = vmatpush3.bf16.msra.mxu1 %v414_v46 }
  0x55   :  { %416 = vmatprep.subr.bf16.mxu1 %v527_v0 }
  0x56   :  { %394 = vmatpush3.bf16.msra.mxu0 %v393_v45 }
  0x58   :  { %418 = vmatpush3.bf16.msra.mxu1 %v417_v50 }
  0x59   :  { %334 = vmatmul.mubr.f32.vlgmr.msra.gmra.mrb[0].mxu0 %v60_v47 }
 0x12c   :  { %v150_v52 = vpop.f32.mrb[0].mxu0 }
 0x12d   :  { %v151_v53 = vadd.f32 %v265_v51, %v150_v52  ;;  %v335_v54 = vpop.f32.mrb[1].mxu0 }
 0x12f   :  { %v154_v55 = vmax.f32 %v151_v53, 0.0 }
 0x131   :  { %369 = vmatmul.mubr.f32.vlgmr.msra.gmra.mrb[0].mxu1 %v154_v55 }
 0x204   :  { %v244_v57 = vpop.f32.mrb[0].mxu1 }
 0x205   :  { %v245_v58 = vadd.f32 %v266_v56, %v244_v57  ;;  %v370_v59 = vpop.f32.mrb[1].mxu1 }
 0x207   :  { %248 = vst [vmem:[#allocation8] sm:$0xff] %v245_v58 }
 0x208   :  { %505 = shalt.err (!%p502_p0)
}
 0x209   :  { %s506_s11 = scalar_lea.hbm %s642_s5, 128 }
 0x20a   :  { %p507_p1 = scmp.ne.s32.totalorder %s642_s5, %s506_s11  ;;  %p510_p2 = scmp.lt.u32.totalorder %s506_s11, %s642_s5 }
 0x20c   :  { %p512_p3 = pnand %p510_p2, %p507_p1 }
 0x20e   :  { %515 = shalt.err (!%p512_p3)
}
 0x20f   :  { %258 = dma.vmem_to_hbm [thread:$0]  %s256_s8, 128, %s642_s5, [#allocation4]  }
 0x210   :  { %520 = dma.done.wait [#allocation4], 128  }
 0x211   :  { %521 = vsyncadd [#allocation4], 4294967168 }
 0x212   :  { %262 = vsyncpa [#allocation3], 1 }
 0x213   :  { %263 = vsyncpa [#allocation6], 1 }
 0x214   :  { %264 = vsyncpa [#allocation4], 1 }

</bundles_post_ra>
